<compile_context>
chip_gen: v6e
topology: v6e:2x2x1
jax: 0.10.0
libtpu: 0.0.40
codegen_flags: <defaults>
</compile_context>

<pallas_src>
import jax
import jax.numpy as jnp
from jax.experimental import pallas as pl
from jax.experimental.pallas import tpu as pltpu


def _csiszar_kernel(o_ref, t_ref, part_ref):
    # o_ref, t_ref: (tile_rows, 128) input tiles.
    # part_ref:     (8, 128) f32 per-block partial-sum output (lane-dense).
    o = o_ref[...].astype(jnp.float32)
    t = t_ref[...].astype(jnp.float32)
    val = t * jnp.log(t / o) - t + o

    # Reduce this tile down to one (8,128) vreg group using pure VPU
    # elementwise adds (reshape stays within (8,128) tile boundaries, so it is
    # a free relayout; no XLU cross-lane work inside the kernel).
    tile_rows = val.shape[0]
    part_ref[...] = val.reshape(tile_rows // 8, 8, 128).sum(axis=0)


def csiszar_div(output, target, *, max_tile_rows=2048, lanes=128):
    assert output.shape == target.shape
    n = output.size

    flat_o = output.reshape(-1)
    flat_t = target.reshape(-1)

    # Rows rounded up to a multiple of 8 (sublanes), capped at max_tile_rows.
    rows_raw = pl.cdiv(n, lanes)
    rows8 = pl.cdiv(rows_raw, 8) * 8
    tile_rows = min(max_tile_rows, rows8)
    num_blocks = pl.cdiv(rows8, tile_rows)
    rows = num_blocks * tile_rows
    padded = rows * lanes

    pad = padded - n
    if pad:
        # Pad both tensors with 1.0: contributes exactly 0 (1*log(1) - 1 + 1).
        flat_o = jnp.pad(flat_o, (0, pad), constant_values=1.0)
        flat_t = jnp.pad(flat_t, (0, pad), constant_values=1.0)

    o2 = flat_o.reshape(rows, lanes)
    t2 = flat_t.reshape(rows, lanes)

    partials = pl.pallas_call(
        _csiszar_kernel,
        out_shape=jax.ShapeDtypeStruct((num_blocks * 8, lanes), jnp.float32),
        grid_spec=pltpu.PrefetchScalarGridSpec(
            num_scalar_prefetch=0,
            grid=(num_blocks,),
            in_specs=[
                pl.BlockSpec((tile_rows, lanes), lambda i: (i, 0)),
                pl.BlockSpec((tile_rows, lanes), lambda i: (i, 0)),
            ],
            out_specs=pl.BlockSpec((8, lanes), lambda i: (i, 0)),
        ),
        compiler_params=pltpu.CompilerParams(
            # Blocks are fully independent -> shards across TensorCores on v7x.
            dimension_semantics=("parallel",),
        ),
    )(o2, t2)

    # Tiny final cross-lane reduce over the per-block (8,128) partials.
    return jnp.sum(partials)


if __name__ == "__main__":
    key = jax.random.PRNGKey(0)
    k_out, k_tgt = jax.random.split(key)
    shape = (2, 4, 16, 16)  # NCHW, small synthetic inputs
    # Strictly positive inputs (required by log / division), deterministic.
    output = jax.random.uniform(k_out, shape, jnp.float32, minval=0.1, maxval=2.0)
    target = jax.random.uniform(k_tgt, shape, jnp.float32, minval=0.1, maxval=2.0)

    result = csiszar_div(output, target)
    jax.block_until_ready(result)

    # Pure-JAX reference for sanity.
    ref = jnp.sum(target * jnp.log(target / output) - target + output)
    assert jnp.allclose(result, ref, rtol=1e-5, atol=1e-5), (result, ref)

    print("KERNEL_OK")
</pallas_src>

<mosaic_0001>
module attributes {stable_mosaic.version = 11 : i64} {
  func.func @_csiszar_kernel(%arg0: i32, %arg1: memref<16x128xf32, #tpu.memory_space<vmem>>, %arg2: memref<16x128xf32, #tpu.memory_space<vmem>>, %arg3: memref<8x128xf32, #tpu.memory_space<vmem>>) attributes {dimension_semantics = [#tpu.dimension_semantics<parallel>], iteration_bounds = array<i64: 1>, scalar_prefetch = 0 : i64, scratch_operands = 0 : i64, tpu.core_type = #tpu.core_type<tc>, window_params = [{transform_indices = @transform_0, window_bounds = array<i64: 16, 128>}, {transform_indices = @transform_1, window_bounds = array<i64: 16, 128>}, {transform_indices = @transform_2, window_bounds = array<i64: 8, 128>}]} {
    %c0 = arith.constant 0 : index
    %c0_0 = arith.constant 0 : index
    %0 = vector.load %arg1[%c0, %c0_0] : memref<16x128xf32, #tpu.memory_space<vmem>>, vector<16x128xf32>
    %c0_1 = arith.constant 0 : index
    %c0_2 = arith.constant 0 : index
    %1 = vector.load %arg2[%c0_1, %c0_2] : memref<16x128xf32, #tpu.memory_space<vmem>>, vector<16x128xf32>
    %2 = arith.divf %1, %0 : vector<16x128xf32>
    %3 = math.log %2 : vector<16x128xf32>
    %4 = arith.mulf %1, %3 : vector<16x128xf32>
    %5 = arith.subf %4, %1 : vector<16x128xf32>
    %6 = arith.addf %5, %0 : vector<16x128xf32>
    %7 = vector.shape_cast %6 : vector<16x128xf32> to vector<2x8x128xf32>
    %cst = arith.constant dense<0.000000e+00> : vector<8x128xf32>
    %8 = vector.multi_reduction <add>, %7, %cst [0] : vector<2x8x128xf32> to vector<8x128xf32>
    %c0_3 = arith.constant 0 : index
    %c0_4 = arith.constant 0 : index
    %9 = vector.load %arg3[%c0_3, %c0_4] : memref<8x128xf32, #tpu.memory_space<vmem>>, vector<8x128xf32>
    tpu.vector_store %arg3[%c0_3, %c0_4], %8 {strides = array<i32>} : memref<8x128xf32, #tpu.memory_space<vmem>>, vector<8x128xf32>,
    return
  }
  func.func @transform_0(%arg0: i32) -> (i32, i32) {
    %c0_i32 = arith.constant 0 : i32
    %c0_i32_0 = arith.constant 0 : i32
    return %arg0, %c0_i32 : i32, i32
  }
  func.func @transform_1(%arg0: i32) -> (i32, i32) {
    %c0_i32 = arith.constant 0 : i32
    %c0_i32_0 = arith.constant 0 : i32
    return %arg0, %c0_i32 : i32, i32
  }
  func.func @transform_2(%arg0: i32) -> (i32, i32) {
    %c0_i32 = arith.constant 0 : i32
    %c0_i32_0 = arith.constant 0 : i32
    return %arg0, %c0_i32 : i32, i32
  }
}

</mosaic_0001>

<bundles_post_ra>
// kernel: tpu_custom_call.1
= control target key start
LH: loop header
LB: loop body
LE: loop exit
PB: predicated region body
PF: predicated region fallthrough
CT: control target
= control target key end

     0   :  { %7 = vsyncpa [#allocation3], 0  ;;  %s184_s0 = inlined_call_operand.hbm [shape: f32[16,128], index: 0, kind: input, shape index: {}]   ;;  %s185_s1 = inlined_call_operand.hbm [shape: f32[16,128], index: 1, kind: input, shape index: {}]   ;;  %s186_s2 = inlined_call_operand.hbm [shape: f32[8,128], index: 2, kind: output, shape index: {}]  }
   0x1   :  { %8 = vsyncpa [#allocation6], 0 }
   0x2   :  { %9 = vsyncpa [#allocation4], 0  ;;  %s155_s9 = smov [#allocation2]  }
   0x3   :  { %s15_s10 = sshll.u32 %s155_s9, 4  ;;  %s16_s10 = int_to_ptr.vmem [resolvable:$true] %s15_s10 }
   0x4   :  { %s97_s11 = scalar_lea.vmem %s16_s10, 256  ;;  %p102_p1 = scmp.lt.s32.totalorder %s16_s10, %s16_s10 }
   0x5   :  { %p98_p0 = scmp.ne.s32.totalorder %s16_s10, %s97_s11  ;;  %p103_p2 = scmp.lt.s32.totalorder %s97_s11, %s97_s11 }
   0x7   :  { %p104_p3 = por %p103_p2, %p102_p1 }
   0x9   :  { %p105_p4 = pnand %p104_p3, %p98_p0 }
   0xb   :  { %108 = shalt.err (!%p105_p4)
}
   0xc   :  { %s156_s12 = smov 128   ;;  %s157_s13 = smov 8  }
   0xd   :  { %21 = dma.hbm_to_vmem [thread:$0]  %s184_s0, 256, %s16_s10, [#allocation3], %s156_s12, %s156_s12, %s157_s13  }
   0xe   :  { %s158_s16 = smov [#allocation5]  }
   0xf   :  { %s27_s17 = sshll.u32 %s158_s16, 4  ;;  %s28_s17 = int_to_ptr.vmem [resolvable:$true] %s27_s17 }
  0x10   :  { %s117_s18 = scalar_lea.vmem %s28_s17, 256  ;;  %p122_p6 = scmp.lt.s32.totalorder %s28_s17, %s28_s17 }
  0x11   :  { %p118_p5 = scmp.ne.s32.totalorder %s28_s17, %s117_s18  ;;  %p123_p7 = scmp.lt.s32.totalorder %s117_s18, %s117_s18 }
  0x13   :  { %p124_p8 = por %p123_p7, %p122_p6 }
  0x15   :  { %p125_p9 = pnand %p124_p8, %p118_p5 }
  0x17   :  { %128 = shalt.err (!%p125_p9)
}
  0x18   :  { %33 = dma.hbm_to_vmem [thread:$0]  %s185_s1, 256, %s28_s17, [#allocation6], %s156_s12, %s156_s12, %s157_s13  }
  0x19   :  { %149 = dma.done.wait [#allocation3], 256  }
  0x1a   :  { %150 = vsyncadd [#allocation3], 4294967040 }
  0x1b   :  { %151 = dma.done.wait [#allocation6], 256  }
  0x1c   :  { %152 = vsyncadd [#allocation6], 4294967040  ;;  %v40_v0 = vld [vmem:[#allocation2] sm:$0xff]  ;;  %v41_v1 = vld [vmem:[#allocation2 + $0x8] sm:$0xff]  ;;  %s159_s0 = smov [#allocation7]  }
  0x1d   :  { %81 = vrcp.f32 %v40_v0  ;;  %v42_v2 = vld [vmem:[#allocation5] sm:$0xff]  ;;  %v43_v3 = vld [vmem:[#allocation5 + $0x8] sm:$0xff]  ;;  %s66_s1 = sshll.u32 %s159_s0, 4  ;;  %s67_s1 = int_to_ptr.vmem [resolvable:$true] %s66_s1 }
  0x1e   :  { %83 = vrcp.f32 %v41_v1  ;;  %s129_s21 = scalar_lea.vmem %s67_s1, 128  ;;  %p134_p11 = scmp.lt.s32.totalorder %s67_s1, %s67_s1 }
  0x1f   :  { %p130_p10 = scmp.ne.s32.totalorder %s67_s1, %s129_s21  ;;  %p135_p12 = scmp.lt.s32.totalorder %s129_s21, %s129_s21 }
  0x21   :  { %p136_p13 = por %p135_p12, %p134_p11 }
  0x23   :  { %p137_p0 = pnand %p136_p13, %p130_p10 }
  0x2a   :  { %v82_v4 = vpop.eup %81 }
  0x2b   :  { %v84_v5 = vpop.eup %83  ;;  %v45_v6 = vmul.f32 %v82_v4, %v42_v2 }
  0x2c   :  { %v47_v7 = vmul.f32 %v84_v5, %v43_v3 }
  0x2d   :  { %85 = vlog2.f32 %v45_v6 }
  0x2e   :  { %87 = vlog2.f32 %v47_v7 }
  0x3a   :  { %v86_v8 = vpop.eup %85 }
  0x3b   :  { %v88_v9 = vpop.eup %87  ;;  %v49_v10 = vmul.f32 0.6931472, %v86_v8 }
  0x3c   :  { %v51_v11 = vmul.f32 0.6931472, %v88_v9 }
  0x3d   :  { %v52_v12 = vmul.f32 %v49_v10, %v42_v2 }
  0x3e   :  { %v53_v13 = vmul.f32 %v51_v11, %v43_v3 }
  0x3f   :  { %v54_v14 = vsub.f32 %v52_v12, %v42_v2 }
  0x40   :  { %v55_v15 = vsub.f32 %v53_v13, %v43_v3 }
  0x41   :  { %v56_v16 = vadd.f32 %v54_v14, %v40_v0 }
  0x42   :  { %v57_v17 = vadd.f32 %v55_v15, %v41_v1 }
  0x44   :  { %v58_v18 = vadd.f32 %v57_v17, %v56_v16 }
  0x46   :  { %59 = vst [vmem:[#allocation7] sm:$0xff] %v58_v18 }
  0x47   :  { %140 = shalt.err (!%p137_p0)
}
  0x48   :  { %69 = dma.vmem_to_hbm [thread:$0]  %s67_s1, 128, %s186_s2, [#allocation4]  }
  0x49   :  { %153 = dma.done.wait [#allocation4], 128  }
  0x4a   :  { %154 = vsyncadd [#allocation4], 4294967168 }
  0x4b   :  { %73 = vsyncpa [#allocation3], 1 }
  0x4c   :  { %74 = vsyncpa [#allocation6], 1 }
  0x4d   :  { %75 = vsyncpa [#allocation4], 1 }

</bundles_post_ra>
